<compile_context>
chip_gen: v5e
topology: v5e:2x2
jax: 0.10.0
libtpu: 0.0.40
codegen_flags: <defaults>
</compile_context>

<pallas_src>
import math
import functools

import jax
import jax.numpy as jnp
from jax import lax
from jax.experimental import pallas as pl
from jax.experimental.pallas import tpu as pltpu
import numpy as np


def _mha_kernel(q_ref, k_ref, v_ref,
                wq_ref, bq_ref, wk_ref, bk_ref, wv_ref, bv_ref,
                wm_exp_ref, bm_exp_ref,
                o_ref,
                *, num_heads, head_dim, batch_tile, seq_q, seq_kv,
                compute_dtype, stack_heads):
    """One grid step == `batch_tile` batch elements.

    q_ref       : (Bt, Sq, Din) VMEM
    k_ref/v_ref : (Bt, S,  Din) VMEM
    w{q,k,v}    : (Din, E) VMEM     b{q,k,v}: (1, E) VMEM
    wm_exp_ref  : (H, E) VMEM   (Wm[h, g] repeated Dh times along E)
    bm_exp_ref  : (1, E) VMEM   (bm[g]    repeated Dh times along E)
    o_ref       : (Bt, Sq, E) VMEM
    """
    H, Dh = num_heads, head_dim
    Bt, Sq, S = batch_tile, seq_q, seq_kv
    Din = q_ref.shape[-1]
    cd = compute_dtype

    # Flatten the batch tile -> ONE big-M projection matmul per tensor.
    # (Sq/S are multiples of 8 whenever Bt > 1, so this is a free sublane merge.)
    q2 = q_ref[...].reshape(Bt * Sq, Din)
    k2 = k_ref[...].reshape(Bt * S, Din)
    v2 = v_ref[...].reshape(Bt * S, Din)

    inv_sqrt_d = jnp.float32(1.0 / math.sqrt(Dh))

    # MLPLinear_res(num_layers=1) == a single Linear.  MXU operands in
    # compute_dtype (bf16 on v6e/v7x), f32 accumulation.  The 1/sqrt(Dh)
    # score scale is folded into Q once.
    Q = (jnp.dot(q2.astype(cd), wq_ref[...].astype(cd),
                 preferred_element_type=jnp.float32) + bq_ref[...]) * inv_sqrt_d
    K = jnp.dot(k2.astype(cd), wk_ref[...].astype(cd),
                preferred_element_type=jnp.float32) + bk_ref[...]
    V = jnp.dot(v2.astype(cd), wv_ref[...].astype(cd),
                preferred_element_type=jnp.float32) + bv_ref[...]

    Qc = Q.astype(cd)
    Kc = K.astype(cd)
    Vc = V.astype(cd)

    wm_exp = wm_exp_ref[...]                  # (H, E) f32
    wm_exp_c = wm_exp.astype(cd)              # compute-dtype copy (hoisted cast)
    bm_exp = bm_exp_ref[...]                  # (1, E) f32

    # TODO(synk): switch these static loops to lax.fori_loop(..., unroll=True)
    # if Bt*H grows beyond a handful (bounds vreg live ranges).
    for b in range(Bt):
        Qb = Qc[b * Sq:(b + 1) * Sq, :]       # (Sq, E)
        Kb = Kc[b * S:(b + 1) * S, :]         # (S,  E)
        Vb = Vc[b * S:(b + 1) * S, :]         # (S,  E) compute dtype
        Vb32 = V[b * S:(b + 1) * S, :]        # (S,  E) f32

        # merge_att bias term:  bm[g] * colsum(V_g)  ==  colsum(V) * bm_exp.
        bias_row = jnp.sum(Vb32, axis=0, keepdims=True) * bm_exp      # (1, E)

        def attn_for_head(h):
            Qh = Qb[:, h * Dh:(h + 1) * Dh]   # (Sq, Dh)
            Kh = Kb[:, h * Dh:(h + 1) * Dh]   # (S,  Dh)
            # Canonical A @ B^T score pattern (same dimension numbers as the
            # reference TPU flash-attention kernel; no K transpose emitted).
            sc = lax.dot_general(Qh, Kh,
                                 dimension_numbers=(((1,), (1,)), ((), ())),
                                 preferred_element_type=jnp.float32)  # (Sq, S)
            sc = sc - jnp.max(sc, axis=-1, keepdims=True)
            e = jnp.exp(sc)                                           # f32 EUP
            return e * pl.reciprocal(jnp.sum(e, axis=-1, keepdims=True),
                                     approx=True)                     # (Sq, S)

        if stack_heads:
            # Folded merge_att as ONE long-contraction MXU matmul:
            #   out = [attn_1 .. attn_H] @ [V*wm_1 ; .. ; V*wm_H]
            A = jnp.concatenate([attn_for_head(h) for h in range(H)],
                                axis=1).astype(cd)                    # (Sq, H*S)
            Vs = jnp.concatenate([Vb * wm_exp_c[h:h + 1, :] for h in range(H)],
                                 axis=0)                              # (H*S, E)
            out_b = jnp.dot(A, Vs, preferred_element_type=jnp.float32)
        else:
            # Long-S fallback: one attention map live at a time.
            out_b = None
            for h in range(H):
                attn = attn_for_head(h)
                ctx = jnp.dot(attn.astype(cd), Vb,
                              preferred_element_type=jnp.float32)     # (Sq, E)
                term = ctx * wm_exp[h:h + 1, :]
                out_b = term if out_b is None else out_b + term

        o_ref[b] = (out_b + bias_row).astype(o_ref.dtype)


def multihead_attention_operator(q, k, v, params, *, num_heads,
                                 compute_dtype=jnp.float32,
                                 batch_tile=None):
    """q: (B, Sq, Din), k/v: (B, S, Din) -> (B, Sq, E)."""
    B, Sq, Din = q.shape
    S = k.shape[1]
    assert v.shape[1] == S and k.shape[2] == Din and v.shape[2] == Din
    Wq, bq, Wk, bk, Wv, bv, Wm, bm = params
    E = Wq.shape[1]
    assert E % num_heads == 0, "embed_dim must be divisible by num_heads"
    head_dim = E // num_heads

    f32 = jnp.float32
    Wq, Wk, Wv = Wq.astype(f32), Wk.astype(f32), Wv.astype(f32)
    bq = bq.reshape(1, E).astype(f32)
    bk = bk.reshape(1, E).astype(f32)
    bv = bv.reshape(1, E).astype(f32)

    # Pre-expand merge_att so the kernel folds it into the attn@V contraction:
    #   Wm_exp[h, g*Dh + d] = Wm[h, g],   bm_exp[0, g*Dh + d] = bm[g]
    Wm_exp = jnp.repeat(Wm.astype(f32), head_dim, axis=1)                   # (H, E)
    bm_exp = jnp.repeat(bm.reshape(1, num_heads).astype(f32),
                        head_dim, axis=1)                                   # (1, E)

    # Batch several elements per grid step: projection matmuls get M = Bt*Sq
    # rows (MXU fill) and the fixed per-step overhead is amortized.  Bt > 1
    # requires Sq, S multiples of 8 so the in-kernel (Bt,Sq,Din)->(Bt*Sq,Din)
    # merge stays a free sublane merge.
    if batch_tile is None:
        if Sq % 8 == 0 and S % 8 == 0:
            batch_tile = max(1, min(B, 8, max(1, 128 // Sq)))
        else:
            batch_tile = 1
    batch_tile = max(1, min(batch_tile, B))

    Bp = pl.cdiv(B, batch_tile) * batch_tile
    if Bp != B:
        pad = Bp - B
        q = jnp.pad(q, ((0, pad), (0, 0), (0, 0)))
        k = jnp.pad(k, ((0, pad), (0, 0), (0, 0)))
        v = jnp.pad(v, ((0, pad), (0, 0), (0, 0)))

    # Keep all H attention maps live (single long-K matmul) only while they
    # comfortably fit in vregs/VMEM; otherwise one map at a time.
    stack_heads = (num_heads * S) <= 2048

    kernel = functools.partial(
        _mha_kernel, num_heads=num_heads, head_dim=head_dim,
        batch_tile=batch_tile, seq_q=Sq, seq_kv=S,
        compute_dtype=compute_dtype, stack_heads=stack_heads)

    per_block = lambda i: (i, 0, 0)
    full_2d = lambda i: (0, 0)

    out = pl.pallas_call(
        kernel,
        out_shape=jax.ShapeDtypeStruct((Bp, Sq, E), jnp.float32),
        grid=(Bp // batch_tile,),
        in_specs=[
            pl.BlockSpec((batch_tile, Sq, Din), per_block),   # q
            pl.BlockSpec((batch_tile, S, Din), per_block),    # k
            pl.BlockSpec((batch_tile, S, Din), per_block),    # v
            pl.BlockSpec((Din, E), full_2d),                  # Wq
            pl.BlockSpec((1, E), full_2d),                    # bq
            pl.BlockSpec((Din, E), full_2d),                  # Wk
            pl.BlockSpec((1, E), full_2d),                    # bk
            pl.BlockSpec((Din, E), full_2d),                  # Wv
            pl.BlockSpec((1, E), full_2d),                    # bv
            pl.BlockSpec((num_heads, E), full_2d),            # Wm_exp
            pl.BlockSpec((1, E), full_2d),                    # bm_exp
        ],
        out_specs=pl.BlockSpec((batch_tile, Sq, E), per_block),
        compiler_params=pltpu.CompilerParams(
            dimension_semantics=("parallel",),
            vmem_limit_bytes=32 * 1024 * 1024),
    )(q.astype(f32), k.astype(f32), v.astype(f32),
      Wq, bq, Wk, bk, Wv, bv, Wm_exp, bm_exp)

    return out[:B] if Bp != B else out


def reference(q, k, v, params, *, num_heads):
    """Pure-JAX mirror of the PyTorch forward for verification."""
    Wq, bq, Wk, bk, Wv, bv, Wm, bm = params
    B, Sq, _ = q.shape
    S = k.shape[1]
    E = Wq.shape[1]
    Dh = E // num_heads
    Q = q @ Wq + bq
    K = k @ Wk + bk
    V = v @ Wv + bv
    Qh = Q.reshape(B, Sq, num_heads, Dh).transpose(0, 2, 1, 3)
    Kh = K.reshape(B, S, num_heads, Dh).transpose(0, 2, 1, 3)
    Vh = V.reshape(B, S, num_heads, Dh).transpose(0, 2, 1, 3)
    scores = jnp.einsum('bhqd,bhkd->bhqk', Qh, Kh) / jnp.sqrt(jnp.float32(Dh))
    attn = jax.nn.softmax(scores, axis=-1)
    conc = attn.transpose(0, 2, 3, 1)                 # (B, Sq, S, H)
    merged = conc @ Wm + bm                           # merge_att linear over heads
    aw = merged.transpose(0, 3, 1, 2)                 # (B, H, Sq, S)
    out = jnp.einsum('bhqk,bhkd->bhqd', aw, Vh)
    return out.transpose(0, 2, 1, 3).reshape(B, Sq, E)


def xavier_normal(key, shape):
    fan_in, fan_out = shape[0], shape[1]
    std = math.sqrt(2.0 / (fan_in + fan_out))
    return std * jax.random.normal(key, shape, dtype=jnp.float32)


if __name__ == "__main__":
    # Small deterministic setup consistent with the module.
    B, Sq, S = 2, 8, 8
    input_dim, embed_dim, num_heads = 16, 32, 4

    key = jax.random.PRNGKey(0)
    keys = jax.random.split(key, 12)

    q = jax.random.normal(keys[0], (B, Sq, input_dim), dtype=jnp.float32)
    k = jax.random.normal(keys[1], (B, S, input_dim), dtype=jnp.float32)
    v = jax.random.normal(keys[2], (B, S, input_dim), dtype=jnp.float32)

    Wq = xavier_normal(keys[3], (input_dim, embed_dim))
    Wk = xavier_normal(keys[4], (input_dim, embed_dim))
    Wv = xavier_normal(keys[5], (input_dim, embed_dim))
    Wm = xavier_normal(keys[6], (num_heads, num_heads))
    bq = 0.01 * jax.random.normal(keys[7], (1, embed_dim), dtype=jnp.float32)
    bk = 0.01 * jax.random.normal(keys[8], (1, embed_dim), dtype=jnp.float32)
    bv = 0.01 * jax.random.normal(keys[9], (1, embed_dim), dtype=jnp.float32)
    bm = 0.01 * jax.random.normal(keys[10], (num_heads,), dtype=jnp.float32)

    params = (Wq, bq, Wk, bk, Wv, bv, Wm, bm)

    ref = jax.block_until_ready(reference(q, k, v, params, num_heads=num_heads))

    # f32 MXU-operand path (numerically closest; safe on all generations).
    out = jax.block_until_ready(
        multihead_attention_operator(q, k, v, params, num_heads=num_heads))
    # Tolerance loosened slightly vs. f32-exact because the softmax denominator
    # uses the hardware approximate reciprocal (EUP vrcp).
    np.testing.assert_allclose(np.asarray(out), np.asarray(ref),
                               rtol=1e-2, atol=1e-2)

    # bf16 MXU-operand / f32-accumulate path (recommended on v6e/v7x; softmax
    # and scale-adds stay f32 so this is also legal on v5e).
    out_bf16 = jax.block_until_ready(
        multihead_attention_operator(q, k, v, params, num_heads=num_heads,
                                     compute_dtype=jnp.bfloat16))
    np.testing.assert_allclose(np.asarray(out_bf16), np.asarray(ref),
                               rtol=5e-2, atol=5e-2)

    print("KERNEL_OK")
</pallas_src>

<mosaic_0001>
module attributes {stable_mosaic.version = 11 : i64} {
  func.func @_mha_kernel(%arg0: i32, %arg1: memref<2x8x16xf32, #tpu.memory_space<vmem>>, %arg2: memref<2x8x16xf32, #tpu.memory_space<vmem>>, %arg3: memref<2x8x16xf32, #tpu.memory_space<vmem>>, %arg4: memref<16x32xf32, #tpu.memory_space<vmem>>, %arg5: memref<1x32xf32, #tpu.memory_space<vmem>>, %arg6: memref<16x32xf32, #tpu.memory_space<vmem>>, %arg7: memref<1x32xf32, #tpu.memory_space<vmem>>, %arg8: memref<16x32xf32, #tpu.memory_space<vmem>>, %arg9: memref<1x32xf32, #tpu.memory_space<vmem>>, %arg10: memref<4x32xf32, #tpu.memory_space<vmem>>, %arg11: memref<1x32xf32, #tpu.memory_space<vmem>>, %arg12: memref<2x8x32xf32, #tpu.memory_space<vmem>>) attributes {dimension_semantics = [#tpu.dimension_semantics<parallel>], iteration_bounds = array<i64: 1>, scalar_prefetch = 0 : i64, scratch_operands = 0 : i64, tpu.core_type = #tpu.core_type<tc>, window_params = [{transform_indices = @transform_0, window_bounds = array<i64: 2, 8, 16>}, {transform_indices = @transform_1, window_bounds = array<i64: 2, 8, 16>}, {transform_indices = @transform_2, window_bounds = array<i64: 2, 8, 16>}, {pipeline_mode = #tpu.pipeline_mode<synchronous>, transform_indices = @transform_3, window_bounds = array<i64: 16, 32>}, {pipeline_mode = #tpu.pipeline_mode<synchronous>, transform_indices = @transform_4, window_bounds = array<i64: 1, 32>}, {pipeline_mode = #tpu.pipeline_mode<synchronous>, transform_indices = @transform_5, window_bounds = array<i64: 16, 32>}, {pipeline_mode = #tpu.pipeline_mode<synchronous>, transform_indices = @transform_6, window_bounds = array<i64: 1, 32>}, {pipeline_mode = #tpu.pipeline_mode<synchronous>, transform_indices = @transform_7, window_bounds = array<i64: 16, 32>}, {pipeline_mode = #tpu.pipeline_mode<synchronous>, transform_indices = @transform_8, window_bounds = array<i64: 1, 32>}, {pipeline_mode = #tpu.pipeline_mode<synchronous>, transform_indices = @transform_9, window_bounds = array<i64: 4, 32>}, {pipeline_mode = #tpu.pipeline_mode<synchronous>, transform_indices = @transform_10, window_bounds = array<i64: 1, 32>}, {transform_indices = @transform_11, window_bounds = array<i64: 2, 8, 32>}]} {
    %c0 = arith.constant 0 : index
    %c0_0 = arith.constant 0 : index
    %c0_1 = arith.constant 0 : index
    %0 = vector.load %arg1[%c0, %c0_0, %c0_1] : memref<2x8x16xf32, #tpu.memory_space<vmem>>, vector<2x8x16xf32>
    %1 = vector.shape_cast %0 : vector<2x8x16xf32> to vector<16x16xf32>
    %c0_2 = arith.constant 0 : index
    %c0_3 = arith.constant 0 : index
    %c0_4 = arith.constant 0 : index
    %2 = vector.load %arg2[%c0_2, %c0_3, %c0_4] : memref<2x8x16xf32, #tpu.memory_space<vmem>>, vector<2x8x16xf32>
    %3 = vector.shape_cast %2 : vector<2x8x16xf32> to vector<16x16xf32>
    %c0_5 = arith.constant 0 : index
    %c0_6 = arith.constant 0 : index
    %c0_7 = arith.constant 0 : index
    %4 = vector.load %arg3[%c0_5, %c0_6, %c0_7] : memref<2x8x16xf32, #tpu.memory_space<vmem>>, vector<2x8x16xf32>
    %5 = vector.shape_cast %4 : vector<2x8x16xf32> to vector<16x16xf32>
    %c0_8 = arith.constant 0 : index
    %c0_9 = arith.constant 0 : index
    %6 = vector.load %arg4[%c0_8, %c0_9] : memref<16x32xf32, #tpu.memory_space<vmem>>, vector<16x32xf32>
    %cst = arith.constant dense<0.000000e+00> : vector<16x32xf32>
    %7 = tpu.matmul %1, %6, %cst {dimension_numbers = #tpu.dot_dimension_numbers<[1], [0], [0], [1], [0, 0, 1, 1], [], []>} : vector<16x16xf32>, vector<16x32xf32>, vector<16x32xf32> -> vector<16x32xf32>
    %c0_10 = arith.constant 0 : index
    %c0_11 = arith.constant 0 : index
    %8 = vector.load %arg5[%c0_10, %c0_11] : memref<1x32xf32, #tpu.memory_space<vmem>>, vector<1x32xf32>
    %9 = vector.broadcast %8 : vector<1x32xf32> to vector<16x32xf32>
    %10 = arith.addf %7, %9 : vector<16x32xf32>
    %cst_12 = arith.constant 0.353553385 : f32
    %11 = vector.broadcast %cst_12 : f32 to vector<16x32xf32>
    %12 = arith.mulf %10, %11 : vector<16x32xf32>
    %c0_13 = arith.constant 0 : index
    %c0_14 = arith.constant 0 : index
    %13 = vector.load %arg6[%c0_13, %c0_14] : memref<16x32xf32, #tpu.memory_space<vmem>>, vector<16x32xf32>
    %cst_15 = arith.constant dense<0.000000e+00> : vector<16x32xf32>
    %14 = tpu.matmul %3, %13, %cst_15 {dimension_numbers = #tpu.dot_dimension_numbers<[1], [0], [0], [1], [0, 0, 1, 1], [], []>} : vector<16x16xf32>, vector<16x32xf32>, vector<16x32xf32> -> vector<16x32xf32>
    %c0_16 = arith.constant 0 : index
    %c0_17 = arith.constant 0 : index
    %15 = vector.load %arg7[%c0_16, %c0_17] : memref<1x32xf32, #tpu.memory_space<vmem>>, vector<1x32xf32>
    %16 = vector.broadcast %15 : vector<1x32xf32> to vector<16x32xf32>
    %17 = arith.addf %14, %16 : vector<16x32xf32>
    %c0_18 = arith.constant 0 : index
    %c0_19 = arith.constant 0 : index
    %18 = vector.load %arg8[%c0_18, %c0_19] : memref<16x32xf32, #tpu.memory_space<vmem>>, vector<16x32xf32>
    %cst_20 = arith.constant dense<0.000000e+00> : vector<16x32xf32>
    %19 = tpu.matmul %5, %18, %cst_20 {dimension_numbers = #tpu.dot_dimension_numbers<[1], [0], [0], [1], [0, 0, 1, 1], [], []>} : vector<16x16xf32>, vector<16x32xf32>, vector<16x32xf32> -> vector<16x32xf32>
    %c0_21 = arith.constant 0 : index
    %c0_22 = arith.constant 0 : index
    %20 = vector.load %arg9[%c0_21, %c0_22] : memref<1x32xf32, #tpu.memory_space<vmem>>, vector<1x32xf32>
    %21 = vector.broadcast %20 : vector<1x32xf32> to vector<16x32xf32>
    %22 = arith.addf %19, %21 : vector<16x32xf32>
    %c0_23 = arith.constant 0 : index
    %c0_24 = arith.constant 0 : index
    %23 = vector.load %arg10[%c0_23, %c0_24] : memref<4x32xf32, #tpu.memory_space<vmem>>, vector<4x32xf32>
    %c0_25 = arith.constant 0 : index
    %c0_26 = arith.constant 0 : index
    %24 = vector.load %arg11[%c0_25, %c0_26] : memref<1x32xf32, #tpu.memory_space<vmem>>, vector<1x32xf32>
    %25 = vector.extract_strided_slice %12 {offsets = [0, 0], sizes = [8, 32], strides = [1, 1]} : vector<16x32xf32> to vector<8x32xf32>
    %26 = vector.extract_strided_slice %17 {offsets = [0, 0], sizes = [8, 32], strides = [1, 1]} : vector<16x32xf32> to vector<8x32xf32>
    %27 = vector.extract_strided_slice %22 {offsets = [0, 0], sizes = [8, 32], strides = [1, 1]} : vector<16x32xf32> to vector<8x32xf32>
    %28 = vector.extract_strided_slice %22 {offsets = [0, 0], sizes = [8, 32], strides = [1, 1]} : vector<16x32xf32> to vector<8x32xf32>
    %cst_27 = arith.constant dense<0.000000e+00> : vector<32xf32>
    %29 = vector.multi_reduction <add>, %28, %cst_27 [0] : vector<8x32xf32> to vector<32xf32>
    %30 = vector.shape_cast %29 : vector<32xf32> to vector<1x32xf32>
    %31 = arith.mulf %30, %24 : vector<1x32xf32>
    %32 = vector.extract_strided_slice %25 {offsets = [0, 0], sizes = [8, 8], strides = [1, 1]} : vector<8x32xf32> to vector<8x8xf32>
    %33 = vector.extract_strided_slice %26 {offsets = [0, 0], sizes = [8, 8], strides = [1, 1]} : vector<8x32xf32> to vector<8x8xf32>
    %cst_28 = arith.constant dense<0.000000e+00> : vector<8x8xf32>
    %34 = tpu.matmul %32, %33, %cst_28 {dimension_numbers = #tpu.dot_dimension_numbers<[1], [1], [0], [0], [0, 0, 1, 0], [], []>} : vector<8x8xf32>, vector<8x8xf32>, vector<8x8xf32> -> vector<8x8xf32>
    %cst_29 = arith.constant dense<0xFF800000> : vector<8xf32>
    %35 = vector.multi_reduction <maximumf>, %34, %cst_29 [1] : vector<8x8xf32> to vector<8xf32>
    %36 = vector.shape_cast %35 : vector<8xf32> to vector<8x1xf32>
    %37 = vector.broadcast %36 : vector<8x1xf32> to vector<8x8xf32>
    %38 = arith.subf %34, %37 : vector<8x8xf32>
    %39 = math.exp %38 : vector<8x8xf32>
    %cst_30 = arith.constant dense<0.000000e+00> : vector<8xf32>
    %40 = vector.multi_reduction <add>, %39, %cst_30 [1] : vector<8x8xf32> to vector<8xf32>
    %41 = vector.shape_cast %40 : vector<8xf32> to vector<8x1xf32>
    %42 = tpu.reciprocal %41 {approx = true} : vector<8x1xf32> -> vector<8x1xf32>
    %43 = vector.broadcast %42 : vector<8x1xf32> to vector<8x8xf32>
    %44 = arith.mulf %39, %43 : vector<8x8xf32>
    %45 = vector.extract_strided_slice %25 {offsets = [0, 8], sizes = [8, 8], strides = [1, 1]} : vector<8x32xf32> to vector<8x8xf32>
    %46 = vector.extract_strided_slice %26 {offsets = [0, 8], sizes = [8, 8], strides = [1, 1]} : vector<8x32xf32> to vector<8x8xf32>
    %cst_31 = arith.constant dense<0.000000e+00> : vector<8x8xf32>
    %47 = tpu.matmul %45, %46, %cst_31 {dimension_numbers = #tpu.dot_dimension_numbers<[1], [1], [0], [0], [0, 0, 1, 0], [], []>} : vector<8x8xf32>, vector<8x8xf32>, vector<8x8xf32> -> vector<8x8xf32>
    %cst_32 = arith.constant dense<0xFF800000> : vector<8xf32>
    %48 = vector.multi_reduction <maximumf>, %47, %cst_32 [1] : vector<8x8xf32> to vector<8xf32>
    %49 = vector.shape_cast %48 : vector<8xf32> to vector<8x1xf32>
    %50 = vector.broadcast %49 : vector<8x1xf32> to vector<8x8xf32>
    %51 = arith.subf %47, %50 : vector<8x8xf32>
    %52 = math.exp %51 : vector<8x8xf32>
    %cst_33 = arith.constant dense<0.000000e+00> : vector<8xf32>
    %53 = vector.multi_reduction <add>, %52, %cst_33 [1] : vector<8x8xf32> to vector<8xf32>
    %54 = vector.shape_cast %53 : vector<8xf32> to vector<8x1xf32>
    %55 = tpu.reciprocal %54 {approx = true} : vector<8x1xf32> -> vector<8x1xf32>
    %56 = vector.broadcast %55 : vector<8x1xf32> to vector<8x8xf32>
    %57 = arith.mulf %52, %56 : vector<8x8xf32>
    %58 = vector.extract_strided_slice %25 {offsets = [0, 16], sizes = [8, 8], strides = [1, 1]} : vector<8x32xf32> to vector<8x8xf32>
    %59 = vector.extract_strided_slice %26 {offsets = [0, 16], sizes = [8, 8], strides = [1, 1]} : vector<8x32xf32> to vector<8x8xf32>
    %cst_34 = arith.constant dense<0.000000e+00> : vector<8x8xf32>
    %60 = tpu.matmul %58, %59, %cst_34 {dimension_numbers = #tpu.dot_dimension_numbers<[1], [1], [0], [0], [0, 0, 1, 0], [], []>} : vector<8x8xf32>, vector<8x8xf32>, vector<8x8xf32> -> vector<8x8xf32>
    %cst_35 = arith.constant dense<0xFF800000> : vector<8xf32>
    %61 = vector.multi_reduction <maximumf>, %60, %cst_35 [1] : vector<8x8xf32> to vector<8xf32>
    %62 = vector.shape_cast %61 : vector<8xf32> to vector<8x1xf32>
    %63 = vector.broadcast %62 : vector<8x1xf32> to vector<8x8xf32>
    %64 = arith.subf %60, %63 : vector<8x8xf32>
    %65 = math.exp %64 : vector<8x8xf32>
    %cst_36 = arith.constant dense<0.000000e+00> : vector<8xf32>
    %66 = vector.multi_reduction <add>, %65, %cst_36 [1] : vector<8x8xf32> to vector<8xf32>
    %67 = vector.shape_cast %66 : vector<8xf32> to vector<8x1xf32>
    %68 = tpu.reciprocal %67 {approx = true} : vector<8x1xf32> -> vector<8x1xf32>
    %69 = vector.broadcast %68 : vector<8x1xf32> to vector<8x8xf32>
    %70 = arith.mulf %65, %69 : vector<8x8xf32>
    %71 = vector.extract_strided_slice %25 {offsets = [0, 24], sizes = [8, 8], strides = [1, 1]} : vector<8x32xf32> to vector<8x8xf32>
    %72 = vector.extract_strided_slice %26 {offsets = [0, 24], sizes = [8, 8], strides = [1, 1]} : vector<8x32xf32> to vector<8x8xf32>
    %cst_37 = arith.constant dense<0.000000e+00> : vector<8x8xf32>
    %73 = tpu.matmul %71, %72, %cst_37 {dimension_numbers = #tpu.dot_dimension_numbers<[1], [1], [0], [0], [0, 0, 1, 0], [], []>} : vector<8x8xf32>, vector<8x8xf32>, vector<8x8xf32> -> vector<8x8xf32>
    %cst_38 = arith.constant dense<0xFF800000> : vector<8xf32>
    %74 = vector.multi_reduction <maximumf>, %73, %cst_38 [1] : vector<8x8xf32> to vector<8xf32>
    %75 = vector.shape_cast %74 : vector<8xf32> to vector<8x1xf32>
    %76 = vector.broadcast %75 : vector<8x1xf32> to vector<8x8xf32>
    %77 = arith.subf %73, %76 : vector<8x8xf32>
    %78 = math.exp %77 : vector<8x8xf32>
    %cst_39 = arith.constant dense<0.000000e+00> : vector<8xf32>
    %79 = vector.multi_reduction <add>, %78, %cst_39 [1] : vector<8x8xf32> to vector<8xf32>
    %80 = vector.shape_cast %79 : vector<8xf32> to vector<8x1xf32>
    %81 = tpu.reciprocal %80 {approx = true} : vector<8x1xf32> -> vector<8x1xf32>
    %82 = vector.broadcast %81 : vector<8x1xf32> to vector<8x8xf32>
    %83 = arith.mulf %78, %82 : vector<8x8xf32>
    %84 = tpu.concatenate %44, %57, %70, %83 in 1 : vector<8x8xf32>, vector<8x8xf32>, vector<8x8xf32>, vector<8x8xf32> -> vector<8x32xf32>
    %85 = vector.extract_strided_slice %23 {offsets = [0, 0], sizes = [1, 32], strides = [1, 1]} : vector<4x32xf32> to vector<1x32xf32>
    %86 = vector.broadcast %85 : vector<1x32xf32> to vector<8x32xf32>
    %87 = arith.mulf %27, %86 : vector<8x32xf32>
    %88 = vector.extract_strided_slice %23 {offsets = [1, 0], sizes = [1, 32], strides = [1, 1]} : vector<4x32xf32> to vector<1x32xf32>
    %89 = vector.broadcast %88 : vector<1x32xf32> to vector<8x32xf32>
    %90 = arith.mulf %27, %89 : vector<8x32xf32>
    %91 = vector.extract_strided_slice %23 {offsets = [2, 0], sizes = [1, 32], strides = [1, 1]} : vector<4x32xf32> to vector<1x32xf32>
    %92 = vector.broadcast %91 : vector<1x32xf32> to vector<8x32xf32>
    %93 = arith.mulf %27, %92 : vector<8x32xf32>
    %94 = vector.extract_strided_slice %23 {offsets = [3, 0], sizes = [1, 32], strides = [1, 1]} : vector<4x32xf32> to vector<1x32xf32>
    %95 = vector.broadcast %94 : vector<1x32xf32> to vector<8x32xf32>
    %96 = arith.mulf %27, %95 : vector<8x32xf32>
    %97 = tpu.concatenate %87, %90, %93, %96 in 0 : vector<8x32xf32>, vector<8x32xf32>, vector<8x32xf32>, vector<8x32xf32> -> vector<32x32xf32>
    %cst_40 = arith.constant dense<0.000000e+00> : vector<8x32xf32>
    %98 = tpu.matmul %84, %97, %cst_40 {dimension_numbers = #tpu.dot_dimension_numbers<[1], [0], [0], [1], [0, 0, 1, 1], [], []>} : vector<8x32xf32>, vector<32x32xf32>, vector<8x32xf32> -> vector<8x32xf32>
    %99 = vector.broadcast %31 : vector<1x32xf32> to vector<8x32xf32>
    %100 = arith.addf %98, %99 : vector<8x32xf32>
    %c0_41 = arith.constant 0 : index
    %c0_42 = arith.constant 0 : index
    %c0_43 = arith.constant 0 : index
    %101 = vector.load %arg12[%c0_41, %c0_42, %c0_43] : memref<2x8x32xf32, #tpu.memory_space<vmem>>, vector<1x8x32xf32>
    %102 = vector.shape_cast %101 : vector<1x8x32xf32> to vector<8x32xf32>
    %103 = vector.shape_cast %100 : vector<8x32xf32> to vector<1x8x32xf32>
    tpu.vector_store %arg12[%c0_41, %c0_42, %c0_43], %103 {strides = array<i32>} : memref<2x8x32xf32, #tpu.memory_space<vmem>>, vector<1x8x32xf32>,
    %104 = vector.extract_strided_slice %12 {offsets = [8, 0], sizes = [8, 32], strides = [1, 1]} : vector<16x32xf32> to vector<8x32xf32>
    %105 = vector.extract_strided_slice %17 {offsets = [8, 0], sizes = [8, 32], strides = [1, 1]} : vector<16x32xf32> to vector<8x32xf32>
    %106 = vector.extract_strided_slice %22 {offsets = [8, 0], sizes = [8, 32], strides = [1, 1]} : vector<16x32xf32> to vector<8x32xf32>
    %107 = vector.extract_strided_slice %22 {offsets = [8, 0], sizes = [8, 32], strides = [1, 1]} : vector<16x32xf32> to vector<8x32xf32>
    %cst_44 = arith.constant dense<0.000000e+00> : vector<32xf32>
    %108 = vector.multi_reduction <add>, %107, %cst_44 [0] : vector<8x32xf32> to vector<32xf32>
    %109 = vector.shape_cast %108 : vector<32xf32> to vector<1x32xf32>
    %110 = arith.mulf %109, %24 : vector<1x32xf32>
    %111 = vector.extract_strided_slice %104 {offsets = [0, 0], sizes = [8, 8], strides = [1, 1]} : vector<8x32xf32> to vector<8x8xf32>
    %112 = vector.extract_strided_slice %105 {offsets = [0, 0], sizes = [8, 8], strides = [1, 1]} : vector<8x32xf32> to vector<8x8xf32>
    %cst_45 = arith.constant dense<0.000000e+00> : vector<8x8xf32>
    %113 = tpu.matmul %111, %112, %cst_45 {dimension_numbers = #tpu.dot_dimension_numbers<[1], [1], [0], [0], [0, 0, 1, 0], [], []>} : vector<8x8xf32>, vector<8x8xf32>, vector<8x8xf32> -> vector<8x8xf32>
    %cst_46 = arith.constant dense<0xFF800000> : vector<8xf32>
    %114 = vector.multi_reduction <maximumf>, %113, %cst_46 [1] : vector<8x8xf32> to vector<8xf32>
    %115 = vector.shape_cast %114 : vector<8xf32> to vector<8x1xf32>
    %116 = vector.broadcast %115 : vector<8x1xf32> to vector<8x8xf32>
    %117 = arith.subf %113, %116 : vector<8x8xf32>
    %118 = math.exp %117 : vector<8x8xf32>
    %cst_47 = arith.constant dense<0.000000e+00> : vector<8xf32>
    %119 = vector.multi_reduction <add>, %118, %cst_47 [1] : vector<8x8xf32> to vector<8xf32>
    %120 = vector.shape_cast %119 : vector<8xf32> to vector<8x1xf32>
    %121 = tpu.reciprocal %120 {approx = true} : vector<8x1xf32> -> vector<8x1xf32>
    %122 = vector.broadcast %121 : vector<8x1xf32> to vector<8x8xf32>
    %123 = arith.mulf %118, %122 : vector<8x8xf32>
    %124 = vector.extract_strided_slice %104 {offsets = [0, 8], sizes = [8, 8], strides = [1, 1]} : vector<8x32xf32> to vector<8x8xf32>
    %125 = vector.extract_strided_slice %105 {offsets = [0, 8], sizes = [8, 8], strides = [1, 1]} : vector<8x32xf32> to vector<8x8xf32>
    %cst_48 = arith.constant dense<0.000000e+00> : vector<8x8xf32>
    %126 = tpu.matmul %124, %125, %cst_48 {dimension_numbers = #tpu.dot_dimension_numbers<[1], [1], [0], [0], [0, 0, 1, 0], [], []>} : vector<8x8xf32>, vector<8x8xf32>, vector<8x8xf32> -> vector<8x8xf32>
    %cst_49 = arith.constant dense<0xFF800000> : vector<8xf32>
    %127 = vector.multi_reduction <maximumf>, %126, %cst_49 [1] : vector<8x8xf32> to vector<8xf32>
    %128 = vector.shape_cast %127 : vector<8xf32> to vector<8x1xf32>
    %129 = vector.broadcast %128 : vector<8x1xf32> to vector<8x8xf32>
    %130 = arith.subf %126, %129 : vector<8x8xf32>
    %131 = math.exp %130 : vector<8x8xf32>
    %cst_50 = arith.constant dense<0.000000e+00> : vector<8xf32>
    %132 = vector.multi_reduction <add>, %131, %cst_50 [1] : vector<8x8xf32> to vector<8xf32>
    %133 = vector.shape_cast %132 : vector<8xf32> to vector<8x1xf32>
    %134 = tpu.reciprocal %133 {approx = true} : vector<8x1xf32> -> vector<8x1xf32>
    %135 = vector.broadcast %134 : vector<8x1xf32> to vector<8x8xf32>
    %136 = arith.mulf %131, %135 : vector<8x8xf32>
    %137 = vector.extract_strided_slice %104 {offsets = [0, 16], sizes = [8, 8], strides = [1, 1]} : vector<8x32xf32> to vector<8x8xf32>
    %138 = vector.extract_strided_slice %105 {offsets = [0, 16], sizes = [8, 8], strides = [1, 1]} : vector<8x32xf32> to vector<8x8xf32>
    %cst_51 = arith.constant dense<0.000000e+00> : vector<8x8xf32>
    %139 = tpu.matmul %137, %138, %cst_51 {dimension_numbers = #tpu.dot_dimension_numbers<[1], [1], [0], [0], [0, 0, 1, 0], [], []>} : vector<8x8xf32>, vector<8x8xf32>, vector<8x8xf32> -> vector<8x8xf32>
    %cst_52 = arith.constant dense<0xFF800000> : vector<8xf32>
    %140 = vector.multi_reduction <maximumf>, %139, %cst_52 [1] : vector<8x8xf32> to vector<8xf32>
    %141 = vector.shape_cast %140 : vector<8xf32> to vector<8x1xf32>
    %142 = vector.broadcast %141 : vector<8x1xf32> to vector<8x8xf32>
    %143 = arith.subf %139, %142 : vector<8x8xf32>
    %144 = math.exp %143 : vector<8x8xf32>
    %cst_53 = arith.constant dense<0.000000e+00> : vector<8xf32>
    %145 = vector.multi_reduction <add>, %144, %cst_53 [1] : vector<8x8xf32> to vector<8xf32>
    %146 = vector.shape_cast %145 : vector<8xf32> to vector<8x1xf32>
    %147 = tpu.reciprocal %146 {approx = true} : vector<8x1xf32> -> vector<8x1xf32>
    %148 = vector.broadcast %147 : vector<8x1xf32> to vector<8x8xf32>
    %149 = arith.mulf %144, %148 : vector<8x8xf32>
    %150 = vector.extract_strided_slice %104 {offsets = [0, 24], sizes = [8, 8], strides = [1, 1]} : vector<8x32xf32> to vector<8x8xf32>
    %151 = vector.extract_strided_slice %105 {offsets = [0, 24], sizes = [8, 8], strides = [1, 1]} : vector<8x32xf32> to vector<8x8xf32>
    %cst_54 = arith.constant dense<0.000000e+00> : vector<8x8xf32>
    %152 = tpu.matmul %150, %151, %cst_54 {dimension_numbers = #tpu.dot_dimension_numbers<[1], [1], [0], [0], [0, 0, 1, 0], [], []>} : vector<8x8xf32>, vector<8x8xf32>, vector<8x8xf32> -> vector<8x8xf32>
    %cst_55 = arith.constant dense<0xFF800000> : vector<8xf32>
    %153 = vector.multi_reduction <maximumf>, %152, %cst_55 [1] : vector<8x8xf32> to vector<8xf32>
    %154 = vector.shape_cast %153 : vector<8xf32> to vector<8x1xf32>
    %155 = vector.broadcast %154 : vector<8x1xf32> to vector<8x8xf32>
    %156 = arith.subf %152, %155 : vector<8x8xf32>
    %157 = math.exp %156 : vector<8x8xf32>
    %cst_56 = arith.constant dense<0.000000e+00> : vector<8xf32>
    %158 = vector.multi_reduction <add>, %157, %cst_56 [1] : vector<8x8xf32> to vector<8xf32>
    %159 = vector.shape_cast %158 : vector<8xf32> to vector<8x1xf32>
    %160 = tpu.reciprocal %159 {approx = true} : vector<8x1xf32> -> vector<8x1xf32>
    %161 = vector.broadcast %160 : vector<8x1xf32> to vector<8x8xf32>
    %162 = arith.mulf %157, %161 : vector<8x8xf32>
    %163 = tpu.concatenate %123, %136, %149, %162 in 1 : vector<8x8xf32>, vector<8x8xf32>, vector<8x8xf32>, vector<8x8xf32> -> vector<8x32xf32>
    %164 = vector.extract_strided_slice %23 {offsets = [0, 0], sizes = [1, 32], strides = [1, 1]} : vector<4x32xf32> to vector<1x32xf32>
    %165 = vector.broadcast %164 : vector<1x32xf32> to vector<8x32xf32>
    %166 = arith.mulf %106, %165 : vector<8x32xf32>
    %167 = vector.extract_strided_slice %23 {offsets = [1, 0], sizes = [1, 32], strides = [1, 1]} : vector<4x32xf32> to vector<1x32xf32>
    %168 = vector.broadcast %167 : vector<1x32xf32> to vector<8x32xf32>
    %169 = arith.mulf %106, %168 : vector<8x32xf32>
    %170 = vector.extract_strided_slice %23 {offsets = [2, 0], sizes = [1, 32], strides = [1, 1]} : vector<4x32xf32> to vector<1x32xf32>
    %171 = vector.broadcast %170 : vector<1x32xf32> to vector<8x32xf32>
    %172 = arith.mulf %106, %171 : vector<8x32xf32>
    %173 = vector.extract_strided_slice %23 {offsets = [3, 0], sizes = [1, 32], strides = [1, 1]} : vector<4x32xf32> to vector<1x32xf32>
    %174 = vector.broadcast %173 : vector<1x32xf32> to vector<8x32xf32>
    %175 = arith.mulf %106, %174 : vector<8x32xf32>
    %176 = tpu.concatenate %166, %169, %172, %175 in 0 : vector<8x32xf32>, vector<8x32xf32>, vector<8x32xf32>, vector<8x32xf32> -> vector<32x32xf32>
    %cst_57 = arith.constant dense<0.000000e+00> : vector<8x32xf32>
    %177 = tpu.matmul %163, %176, %cst_57 {dimension_numbers = #tpu.dot_dimension_numbers<[1], [0], [0], [1], [0, 0, 1, 1], [], []>} : vector<8x32xf32>, vector<32x32xf32>, vector<8x32xf32> -> vector<8x32xf32>
    %178 = vector.broadcast %110 : vector<1x32xf32> to vector<8x32xf32>
    %179 = arith.addf %177, %178 : vector<8x32xf32>
    %c1 = arith.constant 1 : index
    %c0_58 = arith.constant 0 : index
    %c0_59 = arith.constant 0 : index
    %180 = vector.load %arg12[%c1, %c0_58, %c0_59] : memref<2x8x32xf32, #tpu.memory_space<vmem>>, vector<1x8x32xf32>
    %181 = vector.shape_cast %180 : vector<1x8x32xf32> to vector<8x32xf32>
    %182 = vector.shape_cast %179 : vector<8x32xf32> to vector<1x8x32xf32>
    tpu.vector_store %arg12[%c1, %c0_58, %c0_59], %182 {strides = array<i32>} : memref<2x8x32xf32, #tpu.memory_space<vmem>>, vector<1x8x32xf32>,
    return
  }
  func.func @transform_0(%arg0: i32) -> (i32, i32, i32) {
    %c0_i32 = arith.constant 0 : i32
    %c0_i32_0 = arith.constant 0 : i32
    %c0_i32_1 = arith.constant 0 : i32
    return %arg0, %c0_i32, %c0_i32_0 : i32, i32, i32
  }
  func.func @transform_1(%arg0: i32) -> (i32, i32, i32) {
    %c0_i32 = arith.constant 0 : i32
    %c0_i32_0 = arith.constant 0 : i32
    %c0_i32_1 = arith.constant 0 : i32
    return %arg0, %c0_i32, %c0_i32_0 : i32, i32, i32
  }
  func.func @transform_2(%arg0: i32) -> (i32, i32, i32) {
    %c0_i32 = arith.constant 0 : i32
    %c0_i32_0 = arith.constant 0 : i32
    %c0_i32_1 = arith.constant 0 : i32
    return %arg0, %c0_i32, %c0_i32_0 : i32, i32, i32
  }
  func.func @transform_3(%arg0: i32) -> (i32, i32) {
    %c0_i32 = arith.constant 0 : i32
    %c0_i32_0 = arith.constant 0 : i32
    %c0_i32_1 = arith.constant 0 : i32
    return %c0_i32, %c0_i32_0 : i32, i32
  }
  func.func @transform_4(%arg0: i32) -> (i32, i32) {
    %c0_i32 = arith.constant 0 : i32
    %c0_i32_0 = arith.constant 0 : i32
    %c0_i32_1 = arith.constant 0 : i32
    return %c0_i32, %c0_i32_0 : i32, i32
  }
  func.func @transform_5(%arg0: i32) -> (i32, i32) {
    %c0_i32 = arith.constant 0 : i32
    %c0_i32_0 = arith.constant 0 : i32
    %c0_i32_1 = arith.constant 0 : i32
    return %c0_i32, %c0_i32_0 : i32, i32
  }
  func.func @transform_6(%arg0: i32) -> (i32, i32) {
    %c0_i32 = arith.constant 0 : i32
    %c0_i32_0 = arith.constant 0 : i32
    %c0_i32_1 = arith.constant 0 : i32
    return %c0_i32, %c0_i32_0 : i32, i32
  }
  func.func @transform_7(%arg0: i32) -> (i32, i32) {
    %c0_i32 = arith.constant 0 : i32
    %c0_i32_0 = arith.constant 0 : i32
    %c0_i32_1 = arith.constant 0 : i32
    return %c0_i32, %c0_i32_0 : i32, i32
  }
  func.func @transform_8(%arg0: i32) -> (i32, i32) {
    %c0_i32 = arith.constant 0 : i32
    %c0_i32_0 = arith.constant 0 : i32
    %c0_i32_1 = arith.constant 0 : i32
    return %c0_i32, %c0_i32_0 : i32, i32
  }
  func.func @transform_9(%arg0: i32) -> (i32, i32) {
    %c0_i32 = arith.constant 0 : i32
    %c0_i32_0 = arith.constant 0 : i32
    %c0_i32_1 = arith.constant 0 : i32
    return %c0_i32, %c0_i32_0 : i32, i32
  }
  func.func @transform_10(%arg0: i32) -> (i32, i32) {
    %c0_i32 = arith.constant 0 : i32
    %c0_i32_0 = arith.constant 0 : i32
    %c0_i32_1 = arith.constant 0 : i32
    return %c0_i32, %c0_i32_0 : i32, i32
  }
  func.func @transform_11(%arg0: i32) -> (i32, i32, i32) {
    %c0_i32 = arith.constant 0 : i32
    %c0_i32_0 = arith.constant 0 : i32
    %c0_i32_1 = arith.constant 0 : i32
    return %arg0, %c0_i32, %c0_i32_0 : i32, i32, i32
  }
}

</mosaic_0001>

<bundles_post_ra>
// kernel: tpu_custom_call.1
= control target key start
LH: loop header
LB: loop body
LE: loop exit
PB: predicated region body
PF: predicated region fallthrough
CT: control target
= control target key end

     0   :  { %16 = vsyncpa [#allocation3], 0  ;;  %s1164_s0 = inlined_call_operand.hbm [shape: f32[2,8,16], index: 0, kind: input, shape index: {}]   ;;  %s1165_s1 = inlined_call_operand.hbm [shape: f32[2,8,16], index: 1, kind: input, shape index: {}]   ;;  %s1166_s2 = inlined_call_operand.hbm [shape: f32[2,8,16], index: 2, kind: input, shape index: {}]   ;;  %s1167_s3 = inlined_call_operand.hbm [shape: f32[16,32], index: 3, kind: input, shape index: {}]   ;;  %s1168_s4 = inlined_call_operand.vmem [shape: f32[1,32], index: 4, kind: input, shape index: {}]   ;;  %s1169_s5 = inlined_call_operand.hbm [shape: f32[16,32], index: 5, kind: input, shape index: {}]   ;;  %s1170_s6 = inlined_call_operand.vmem [shape: f32[1,32], index: 6, kind: input, shape index: {}]   ;;  %s1171_s7 = inlined_call_operand.hbm [shape: f32[16,32], index: 7, kind: input, shape index: {}]   ;;  %s1172_s8 = inlined_call_operand.vmem [shape: f32[1,32], index: 8, kind: input, shape index: {}]   ;;  %s1173_s9 = inlined_call_operand.vmem [shape: f32[4,32], index: 9, kind: input, shape index: {}]   ;;  %s1174_s10 = inlined_call_operand.vmem [shape: f32[1,32], index: 10, kind: input, shape index: {}]   ;;  %s1175_s11 = inlined_call_operand.hbm [shape: f32[2,8,32], index: 11, kind: output, shape index: {}]  }
   0x1   :  { %17 = vsyncpa [#allocation6], 0 }
   0x2   :  { %18 = vsyncpa [#allocation9], 0 }
   0x3   :  { %19 = vsyncpa [#allocation12], 0 }
   0x4   :  { %20 = vsyncpa [#allocation4], 0  ;;  %s38_s19 = sshll.u32 %s1165_s1, 4  ;;  %s942_s20 = smov [#allocation5]   ;;  %s39_s19 = int_to_ptr.hbm [resolvable:$true] %s38_s19 }
   0x5   :  { %s40_s21 = sshll.u32 %s942_s20, 4  ;;  %s64_s24 = sshll.u32 %s1167_s3, 4  ;;  %s41_s21 = int_to_ptr.vmem [resolvable:$true] %s40_s21  ;;  %s65_s24 = int_to_ptr.hbm [resolvable:$true] %s64_s24 }
   0x6   :  { %s943_s25 = smov 128   ;;  %s944_s26 = smov 8  }
   0x7   :  { %46 = dma.hbm_to_vmem [thread:$0]  %s39_s19, 256, %s41_s21, [#allocation6], %s943_s25, %s943_s25, %s944_s26  }
   0x8   :  { %s945_s27 = smov [#allocation8]   ;;  %s25_s1 = sshll.u32 %s1164_s0, 4  ;;  %s26_s1 = int_to_ptr.hbm [resolvable:$true] %s25_s1 }
   0x9   :  { %s66_s28 = sshll.u32 %s945_s27, 4  ;;  %s51_s13 = sshll.u32 %s1166_s2, 4  ;;  %s67_s28 = int_to_ptr.vmem [resolvable:$true] %s66_s28  ;;  %s52_s13 = int_to_ptr.hbm [resolvable:$true] %s51_s13 }
   0xa   :  { %72 = dma.hbm_to_vmem [thread:$0]  %s65_s24, 256, %s67_s28, [#allocation9], %s943_s25, %s943_s25, %s944_s26  }
   0xb   :  { %s946_s14 = smov [#allocation2]   ;;  %s947_s16 = smov [#allocation7]  }
   0xc   :  { %s27_s15 = sshll.u32 %s946_s14, 4  ;;  %s53_s0 = sshll.u32 %s947_s16, 4  ;;  %s28_s15 = int_to_ptr.vmem [resolvable:$true] %s27_s15  ;;  %s54_s0 = int_to_ptr.vmem [resolvable:$true] %s53_s0 }
   0xd   :  { %33 = dma.hbm_to_vmem [thread:$0]  %s26_s1, 256, %s28_s15, [#allocation3], %s943_s25, %s943_s25, %s944_s26  }
   0xe   :  { %s79_s19 = sshll.u32 %s1169_s5, 4  ;;  %s94_s21 = sshll.u32 %s1171_s7, 4  ;;  %s80_s19 = int_to_ptr.hbm [resolvable:$true] %s79_s19  ;;  %s95_s21 = int_to_ptr.hbm [resolvable:$true] %s94_s21 }
   0xf   :  { %59 = dma.hbm_to_vmem [thread:$0]  %s52_s13, 256, %s54_s0, [#allocation6], %s943_s25, %s943_s25, %s944_s26  }
  0x10   :  { %s948_s22 = smov [#allocation10]   ;;  %s949_s24 = smov [#allocation11]  }
  0x11   :  { %s81_s23 = sshll.u32 %s948_s22, 4  ;;  %s96_s5 = sshll.u32 %s949_s24, 4  ;;  %s82_s23 = int_to_ptr.vmem [resolvable:$true] %s81_s23  ;;  %s97_s5 = int_to_ptr.vmem [resolvable:$true] %s96_s5 }
  0x12   :  { %87 = dma.hbm_to_vmem [thread:$0]  %s80_s19, 256, %s82_s23, [#allocation9], %s943_s25, %s943_s25, %s944_s26  }
  0x13   :  { %102 = dma.hbm_to_vmem [thread:$0]  %s95_s21, 256, %s97_s5, [#allocation12], %s943_s25, %s943_s25, %s944_s26  }
  0x14   :  { %932 = dma.done.wait [#allocation3], 256  }
  0x15   :  { %933 = vsyncadd [#allocation3], 4294967040 }
  0x16   :  { %934 = dma.done.wait [#allocation6], 512  }
  0x17   :  { %935 = vsyncadd [#allocation6], 4294966784 }
  0x18   :  { %936 = dma.done.wait [#allocation9], 512  }
  0x19   :  { %937 = vsyncadd [#allocation9], 4294966784 }
  0x1a   :  { %938 = dma.done.wait [#allocation12], 256  }
  0x1b   :  { %939 = vsyncadd [#allocation12], 4294967040  ;;  %v140_v0 = vld [vmem:[#allocation8 + $0x8] sm:$0xff]  ;;  %v178_v1 = vld [vmem:[#allocation10 + $0x8] sm:$0xff]  ;;  %vm145_vm0 = vcmask 130048   ;;  %vm258_vm1 = vcmask 64512  }
  0x1c   :  { %v139_v2 = vld [vmem:[#allocation8] sm:$0xff]  ;;  %166 = vmatpush.msra.mxu0 %v140_v0  ;;  %203 = vmatpush.msra.mxu1 %v178_v1  ;;  %v177_v3 = vld [vmem:[#allocation10] sm:$0xff]  ;;  %s950_s30 = smov 112   ;;  %s951_s1 = smov 120   ;;  %v134_v13 = vld [vmem:[#allocation2 + $0x8] sm:$0xff]  ;;  %vm427_vm2 = vcmask 195584  }
  0x1d   :  { %v133_v4 = vld [vmem:[#allocation2] sm:$0xff]  ;;  %v135_v5 = vld [vmem:[#allocation5] sm:$0xff]  ;;  %v136_v14 = vld [vmem:[#allocation5 + $0x8] sm:$0xff]  ;;  %s954_s3 = smov 24   ;;  %vm249_vm3 = vcmask 261120   ;;  %s675_s18 = sshll.u32 %s1175_s11, 4  ;;  %s676_s18 = int_to_ptr.hbm [resolvable:$true] %s675_s18 }
  0x1e   :  { %167 = vmatpush.msra.mxu0 %v139_v2  ;;  %204 = vmatpush.msra.mxu1 %v177_v3  ;;  %v729_v6 = vld [vmem:[%s1168_s4] ss:$0 sm:$0xff]  ;;  %s952_s4 = smov 104   ;;  %v213_v35 = vld [vmem:[#allocation11 + $0x8] sm:$0xff]  ;;  %v212_v36 = vld [vmem:[#allocation11] sm:$0xff] }
  0x1f   :  { %691 = vmatmul.msk.f32.vlgmr.msra.gmra.mxu0 %vm145_vm0, %v133_v4  ;;  %693 = vmatmul.msk.f32.vlgmr.msra.gmra.mxu1 %vm145_vm0, %v135_v5  ;;  %v730_v7 = vld [vmem:[%s1170_s6] ss:$0 sm:$0xff]  ;;  %s953_s6 = smov 16   ;;  %v138_v5 = vld [vmem:[#allocation7 + $0x8] sm:$0xff] }
  0x20   :  { %238 = vmatpush.msra.mxu2 %v213_v35  ;;  %v137_v38 = vld [vmem:[#allocation7] sm:$0xff] }
  0x21   :  { %v731_v2 = vld [vmem:[%s1172_s8] ss:$0 sm:$0xff] }
  0x22   :  { %239 = vmatpush.msra.mxu2 %v212_v36  ;;  %v247_v4 = vld [vmem:[%s1173_s9] sm:$0xf] }
  0x23   :  { %695 = vmatmul.msk.f32.vlgmr.msra.gmra.mxu2 %vm145_vm0, %v137_v38 }
  0x27   :  { %692 = vmatmul.msk.f32.gmra.mxu0 %vm145_vm0, %v134_v13  ;;  %694 = vmatmul.msk.f32.gmra.mxu1 %vm145_vm0, %v136_v14 }
  0x2b   :  { %696 = vmatmul.msk.f32.gmra.mxu2 %vm145_vm0, %v138_v5 }
  0x9c   :  { %v169_v8 = vpop.f32.mrf.mxu0  ;;  %v206_v9 = vpop.f32.mrf.mxu1 }
  0x9d   :  { %v170_v10 = vadd.f32 %v729_v6, %v169_v8  ;;  %v207_v11 = vadd.f32 %v730_v7, %v206_v9  ;;  %v431_v9 = vperm.slane %v247_v4, 1 }
  0x9f   :  { %v175_v12 = vmul.f32 0.35355338, %v170_v10  ;;  %337 = vrot.lane.b32.xlu1 %v207_v11, %s950_s30  ;;  %298 = vrot.lane.b32.xlu0 %v207_v11, %s951_s1 }
  0xa0   :  { %697 = vmatpush.xpose.msk.msra.mxu3 %vm258_vm1, %v207_v11 }
  0xa1   :  { %335 = vrot.lane.b32.xlu2 %v175_v12, %s950_s30 }
  0xa3   :  { %698 = vmatmul.msk.f32.vlgmr.msra.gmra.mxu3 %vm258_vm1, %v175_v12 }
  0xa4   :  { %v172_v21 = vpop.f32.mrf.mxu0  ;;  %v209_v23 = vpop.f32.mrf.mxu1 }
  0xa5   :  { %v173_v22 = vadd.f32 %v729_v6, %v172_v21  ;;  %v1076_v24 = vadd.f32 %v730_v7, %v209_v23  ;;  %v435_v6 = vperm.slane %v247_v4, 3  ;;  %v433_v7 = vperm.slane %v247_v4, 2 }
  0xa6   :  { %v241_v3 = vpop.f32.mrf.mxu2 }
  0xa7   :  { %376 = vrot.lane.b32.xlu1 %v207_v11, %s952_s4  ;;  %296 = vrot.lane.b32.xlu0 %v175_v12, %s951_s1  ;;  %v1078_v25 = vmul.f32 0.35355338, %v173_v22  ;;  %v242_v8 = vadd.f32 %v731_v2, %v241_v3 }
  0xa9   :  { %374 = vrot.lane.b32.xlu2 %v175_v12, %s952_s4  ;;  %v436_v10 = vmul.f32 %v435_v6, %v242_v8  ;;  %v434_v11 = vmul.f32 %v433_v7, %v242_v8  ;;  %v429_v12 = vperm.slane %v247_v4, 0  ;;  %v432_v13 = vmul.f32 %v431_v9, %v242_v8 }
  0xaa   :  { %v250_v36 = vsel %vm249_vm3, %v242_v8, 0.0 }
  0xab   :  { %453 = vmatpush.msrb.mxu2 %v436_v10  ;;  %v430_v14 = vmul.f32 %v429_v12, %v242_v8 }
  0xad   :  { %454 = vmatpush.msrb.mxu2 %v434_v11 }
  0xaf   :  { %455 = vmatpush.msrb.mxu2 %v432_v13 }
  0xb1   :  { %456 = vmatpush.msrb.mxu2 %v430_v14 }
  0xfb   :  { %v336_v17 = vpop.permute.xlu2 %335 }
 0x103   :  { %v375_v20 = vpop.permute.xlu2 %374 }
 0x111   :  { %v338_v15 = vpop.permute.xlu1 %337  ;;  %v299_v16 = vpop.permute.xlu0 %298 }
 0x112   :  { %699 = vmatpush.xpose.msk.msrb.mxu3 %vm258_vm1, %v299_v16  ;;  %701 = vmatpush.xpose.msk.msrb.mxu0 %vm258_vm1, %v338_v15 }
 0x115   :  { %702 = vmatmul.msk.f32.vlgmr.msrb.gmra.mxu0 %vm258_vm1, %v336_v17 }
 0x116   :  { %706 = vmatpush.xpose.msk.msra.mxu3 %vm258_vm1, %v1076_v24 }
 0x119   :  { %v377_v18 = vpop.permute.xlu1 %376  ;;  %v297_v19 = vpop.permute.xlu0 %296 }
 0x11a   :  { %700 = vmatmul.msk.f32.vlgmr.msrb.gmra.mxu3 %vm258_vm1, %v297_v19  ;;  %703 = vmatpush.xpose.msk.msrb.mxu1 %vm258_vm1, %v377_v18 }
 0x11d   :  { %704 = vmatmul.msk.f32.vlgmr.msrb.gmra.mxu1 %vm258_vm1, %v375_v20 }
 0x122   :  { %707 = vmatmul.msk.f32.vlgmr.msra.gmra.mxu3 %vm258_vm1, %v1078_v25 }
 0x126   :  { %v282_v28 = vpop.f32.mrf.mxu3 }
 0x127   :  { %v285_v33 = vsel %vm258_vm1, %v282_v28, -inf }
 0x192   :  { %v360_v26 = vpop.f32.mrf.mxu0 }
 0x193   :  { %v363_v27 = vsel %vm258_vm1, %v360_v26, -inf }
 0x194   :  { %364 = vmax.xlane.f32.xlu1 %v363_v27 }
 0x19a   :  { %v399_v29 = vpop.f32.mrf.mxu1 }
 0x19b   :  { %v402_v30 = vsel %vm258_vm1, %v399_v29, -inf }
 0x19c   :  { %403 = vmax.xlane.f32.xlu2 %v402_v30  ;;  %v244_v30 = vpop.f32.mrf.mxu2 }
 0x19d   :  { %v321_v31 = vpop.f32.mrf.mxu3 }
 0x19e   :  { %v324_v32 = vsel %vm258_vm1, %v321_v31, -inf }
 0x19f   :  { %325 = vmax.xlane.f32.xlu0 %v324_v32 }
 0x1a4   :  { %286 = vmax.xlane.f32.xlu2 %v285_v33 }
 0x207   :  { %v365_v34 = vpop.xlane.xlu1 %364 }
 0x208   :  { %v366_v37 = vsub.f32 %v360_v26, %v365_v34 }
 0x20a   :  { %v367_v39 = vmul.f32 1.442695, %v366_v37  ;;  %v251_v37 = vrot.slane %v250_v36, 4 }
 0x20c   :  { %732 = vpow2.f32 %v367_v39  ;;  %v252_v38 = vadd.f32 %v251_v37, %v250_v36 }
 0x20e   :  { %v253_v39 = vrot.slane %v252_v38, 2 }
 0x20f   :  { %v404_v40 = vpop.xlane.xlu2 %403 }
 0x210   :  { %v405_v41 = vsub.f32 %v399_v29, %v404_v40  ;;  %v254_v40 = vadd.f32 %v253_v39, %v252_v38 }
 0x212   :  { %v733_v42 = vpop.eup %732  ;;  %v406_v43 = vmul.f32 1.442695, %v405_v41  ;;  %v326_v44 = vpop.xlane.xlu0 %325  ;;  %v255_v41 = vrot.slane %v254_v40, 1 }
 0x213   :  { %v327_v45 = vsub.f32 %v321_v31, %v326_v44  ;;  %v369_v46 = vsel %vm258_vm1, %v733_v42, 0.0  ;;  %v1125_v31 = vadd.f32 %v731_v2, %v244_v30 }
 0x214   :  { %734 = vpow2.f32 %v406_v43  ;;  %370 = vadd.xlane.f32.xlu1 %v369_v46  ;;  %v1135_v43 = vld [vmem:[%s1174_s10] sm:$0x1]  ;;  %s955_s10 = smov [#allocation13]  }
 0x215   :  { %v328_v47 = vmul.f32 1.442695, %v327_v45  ;;  %v642_v32 = vmul.f32 %v435_v6, %v1125_v31  ;;  %v641_v33 = vmul.f32 %v433_v7, %v1125_v31  ;;  %v640_v34 = vmul.f32 %v431_v9, %v1125_v31  ;;  %s673_s16 = sshll.u32 %s955_s10, 4  ;;  %s674_s16 = int_to_ptr.vmem [resolvable:$true] %s673_s16 }
 0x216   :  { %v639_v35 = vmul.f32 %v429_v12, %v1125_v31  ;;  %v462_v30 = vsel %vm249_vm3, %v1125_v31, 0.0 }
 0x217   :  { %736 = vpow2.f32 %v328_v47  ;;  %v287_v48 = vpop.xlane.xlu2 %286  ;;  %659 = vmatpush.msrb.mxu3 %v642_v32  ;;  %v463_v32 = vrot.slane %v462_v30, 4 }
 0x218   :  { %v288_v49 = vsub.f32 %v282_v28, %v287_v48 }
 0x219   :  { %660 = vmatpush.msrb.mxu3 %v641_v33  ;;  %v464_v33 = vadd.f32 %v463_v32, %v462_v30 }
 0x21a   :  { %v735_v50 = vpop.eup %734  ;;  %v289_v51 = vmul.f32 1.442695, %v288_v49 }
 0x21b   :  { %v408_v52 = vsel %vm258_vm1, %v735_v50, 0.0  ;;  %661 = vmatpush.msrb.mxu3 %v640_v34  ;;  %v465_v34 = vrot.slane %v464_v33, 2 }
 0x21c   :  { %409 = vadd.xlane.f32.xlu2 %v408_v52  ;;  %738 = vpow2.f32 %v289_v51  ;;  %v493_v52 = vpop.f32.mrf.mxu3 }
 0x21d   :  { %v737_v53 = vpop.eup %736  ;;  %662 = vmatpush.msrb.mxu3 %v639_v35  ;;  %v466_v35 = vadd.f32 %v465_v34, %v464_v33 }
 0x21e   :  { %v330_v54 = vsel %vm258_vm1, %v737_v53, 0.0 }
 0x21f   :  { %331 = vadd.xlane.f32.xlu0 %v330_v54  ;;  %v467_v36 = vrot.slane %v466_v35, 1 }
 0x221   :  { %v468_v37 = vadd.f32 %v467_v36, %v466_v35 }
 0x222   :  { %v739_v55 = vpop.eup %738 }
 0x223   :  { %v291_v56 = vsel %vm258_vm1, %v739_v55, 0.0  ;;  %v469_v38 = vmul.f32 %v468_v37, %v1135_v43 }
 0x225   :  { %v643_v39 = vperm.slane %v469_v38, 0 }
 0x227   :  { %292 = vadd.xlane.f32.xlu0 %v291_v56 }
 0x287   :  { %v371_v57 = vpop.xlane.xlu1 %370 }
 0x288   :  { %740 = vrcp.f32 %v371_v57 }
 0x28e   :  { %v741_v58 = vpop.eup %740 }
 0x28f   :  { %v410_v59 = vpop.xlane.xlu2 %409  ;;  %v373_v60 = vmul.f32 %v741_v58, %v733_v42  ;;  %v256_v42 = vadd.f32 %v255_v41, %v254_v40 }
 0x290   :  { %742 = vrcp.f32 %v410_v59 }
 0x291   :  { %418 = vrot.lane.b32.xlu2 %v373_v60, %s953_s6  ;;  %v257_v44 = vmul.f32 %v256_v42, %v1135_v43 }
 0x292   :  { %v332_v61 = vpop.xlane.xlu0 %331 }
 0x293   :  { %744 = vrcp.f32 %v332_v61  ;;  %v437_v45 = vperm.slane %v257_v44, 0 }
 0x296   :  { %v743_v62 = vpop.eup %742 }
 0x297   :  { %v412_v63 = vmul.f32 %v743_v62, %v735_v50 }
 0x299   :  { %v745_v0 = vpop.eup %744  ;;  %509 = vrot.lane.b32.xlu2 %v1076_v24, %s951_s1  ;;  %422 = vrot.lane.b32.xlu0 %v412_v63, %s954_s3 }
 0x29a   :  { %v334_v1 = vmul.f32 %v745_v0, %v737_v53  ;;  %v293_v17 = vpop.xlane.xlu0 %292 }
 0x29b   :  { %746 = vrcp.f32 %v293_v17 }
 0x29c   :  { %414 = vrot.lane.b32.xlu1 %v334_v1, %s944_s26 }
 0x2a1   :  { %546 = vrot.lane.b32.xlu2 %v1078_v25, %s950_s30  ;;  %585 = vrot.lane.b32.xlu0 %v1078_v25, %s952_s4  ;;  %v747_v18 = vpop.eup %746 }
 0x2a2   :  { %v295_v20 = vmul.f32 %v747_v18, %v739_v55  ;;  %v496_v55 = vsel %vm258_vm1, %v493_v52, -inf }
 0x2a4   :  { %587 = vrot.lane.b32.xlu1 %v1076_v24, %s952_s4 }
 0x2a9   :  { %507 = vrot.lane.b32.xlu0 %v1078_v25, %s951_s1 }
 0x2ac   :  { %548 = vrot.lane.b32.xlu1 %v1076_v24, %s950_s30 }
 0x2eb   :  { %v419_v15 = vpop.permute.xlu2 %418 }
 0x2f3   :  { %v510_v16 = vpop.permute.xlu2 %509 }
 0x2f4   :  { %708 = vmatpush.xpose.msk.msra.mxu0 %vm258_vm1, %v510_v16 }
 0x2fb   :  { %v547_v29 = vpop.permute.xlu2 %546 }
 0x30b   :  { %v423_v19 = vpop.permute.xlu0 %422 }
 0x30e   :  { %v415_v21 = vpop.permute.xlu1 %414 }
 0x30f   :  { %v425_v22 = vsel %vm258_vm1, %v295_v20, %v415_v21 }
 0x310   :  { %v426_v23 = vsel %vm145_vm0, %v425_v22, %v419_v15 }
 0x311   :  { %v428_v24 = vsel %vm427_vm2, %v426_v23, %v423_v19 }
 0x312   :  { %705 = vmatmul.msk.f32.vlgmr.msrb.gmra.mxu2 %vm249_vm3, %v428_v24 }
 0x313   :  { %v586_v25 = vpop.permute.xlu0 %585 }
 0x316   :  { %v588_v26 = vpop.permute.xlu1 %587 }
 0x317   :  { %712 = vmatpush.xpose.msk.msra.mxu2 %vm258_vm1, %v588_v26 }
 0x31a   :  { %713 = vmatmul.msk.f32.vlgmr.msra.gmra.mxu2 %vm258_vm1, %v586_v25 }
 0x31b   :  { %v508_v27 = vpop.permute.xlu0 %507 }
 0x31c   :  { %709 = vmatmul.msk.f32.vlgmr.msra.gmra.mxu0 %vm258_vm1, %v508_v27 }
 0x31e   :  { %v549_v28 = vpop.permute.xlu1 %548 }
 0x31f   :  { %710 = vmatpush.xpose.msk.msra.mxu1 %vm258_vm1, %v549_v28 }
 0x322   :  { %711 = vmatmul.msk.f32.vlgmr.msra.gmra.mxu1 %vm258_vm1, %v547_v29 }
 0x395   :  { %v458_v46 = vpop.f32.mrf.mxu2 }
 0x396   :  { %v459_v47 = vadd.f32 %v458_v46, %v437_v45 }
 0x398   :  { %461 = vst.msk [vmem:[#allocation13] sm:$0xff] %vm249_vm3, %v459_v47 }
 0x399   :  { %v532_v48 = vpop.f32.mrf.mxu0 }
 0x39a   :  { %v535_v49 = vsel %vm258_vm1, %v532_v48, -inf }
 0x39b   :  { %536 = vmax.xlane.f32.xlu1 %v535_v49 }
 0x39d   :  { %v610_v50 = vpop.f32.mrf.mxu2 }
 0x39e   :  { %v613_v51 = vsel %vm258_vm1, %v610_v50, -inf }
 0x39f   :  { %614 = vmax.xlane.f32.xlu2 %v613_v51  ;;  %v571_v53 = vpop.f32.mrf.mxu1 }
 0x3a0   :  { %v574_v54 = vsel %vm258_vm1, %v571_v53, -inf }
 0x3a1   :  { %575 = vmax.xlane.f32.xlu0 %v574_v54 }
 0x3a3   :  { %497 = vmax.xlane.f32.xlu1 %v496_v55 }
 0x40e   :  { %v537_v56 = vpop.xlane.xlu1 %536 }
 0x40f   :  { %v538_v57 = vsub.f32 %v532_v48, %v537_v56 }
 0x411   :  { %v539_v58 = vmul.f32 1.442695, %v538_v57 }
 0x412   :  { %v615_v59 = vpop.xlane.xlu2 %614 }
 0x413   :  { %748 = vpow2.f32 %v539_v58  ;;  %v616_v60 = vsub.f32 %v610_v50, %v615_v59 }
 0x414   :  { %v576_v61 = vpop.xlane.xlu0 %575 }
 0x415   :  { %v617_v62 = vmul.f32 1.442695, %v616_v60  ;;  %v577_v63 = vsub.f32 %v571_v53, %v576_v61 }
 0x416   :  { %v498_v0 = vpop.xlane.xlu1 %497 }
 0x417   :  { %750 = vpow2.f32 %v617_v62  ;;  %v578_v1 = vmul.f32 1.442695, %v577_v63  ;;  %v499_v2 = vsub.f32 %v493_v52, %v498_v0 }
 0x419   :  { %v749_v3 = vpop.eup %748  ;;  %752 = vpow2.f32 %v578_v1  ;;  %v500_v4 = vmul.f32 1.442695, %v499_v2 }
 0x41a   :  { %v541_v5 = vsel %vm258_vm1, %v749_v3, 0.0 }
 0x41b   :  { %754 = vpow2.f32 %v500_v4  ;;  %542 = vadd.xlane.f32.xlu0 %v541_v5 }
 0x41d   :  { %v751_v6 = vpop.eup %750 }
 0x41e   :  { %v619_v7 = vsel %vm258_vm1, %v751_v6, 0.0 }
 0x41f   :  { %v753_v8 = vpop.eup %752  ;;  %620 = vadd.xlane.f32.xlu1 %v619_v7 }
 0x420   :  { %v580_v9 = vsel %vm258_vm1, %v753_v8, 0.0 }
 0x421   :  { %v755_v10 = vpop.eup %754  ;;  %581 = vadd.xlane.f32.xlu2 %v580_v9 }
 0x422   :  { %v502_v11 = vsel %vm258_vm1, %v755_v10, 0.0 }
 0x423   :  { %503 = vadd.xlane.f32.xlu0 %v502_v11 }
 0x48e   :  { %v543_v12 = vpop.xlane.xlu0 %542 }
 0x48f   :  { %756 = vrcp.f32 %v543_v12 }
 0x492   :  { %v621_v13 = vpop.xlane.xlu1 %620 }
 0x493   :  { %758 = vrcp.f32 %v621_v13 }
 0x494   :  { %v582_v14 = vpop.xlane.xlu2 %581 }
 0x495   :  { %v757_v15 = vpop.eup %756  ;;  %760 = vrcp.f32 %v582_v14 }
 0x496   :  { %v545_v16 = vmul.f32 %v757_v15, %v749_v3  ;;  %v504_v21 = vpop.xlane.xlu0 %503 }
 0x497   :  { %762 = vrcp.f32 %v504_v21 }
 0x498   :  { %625 = vrot.lane.b32.xlu2 %v545_v16, %s944_s26 }
 0x499   :  { %v759_v17 = vpop.eup %758 }
 0x49a   :  { %v623_v18 = vmul.f32 %v759_v17, %v751_v6 }
 0x49b   :  { %v761_v19 = vpop.eup %760 }
 0x49c   :  { %633 = vrot.lane.b32.xlu0 %v623_v18, %s954_s3  ;;  %v584_v20 = vmul.f32 %v761_v19, %v753_v8 }
 0x49d   :  { %v763_v22 = vpop.eup %762 }
 0x49e   :  { %629 = vrot.lane.b32.xlu1 %v584_v20, %s953_s6  ;;  %v506_v24 = vmul.f32 %v763_v22, %v755_v10 }
 0x4f2   :  { %v626_v23 = vpop.permute.xlu2 %625 }
 0x4f3   :  { %v636_v25 = vsel %vm258_vm1, %v506_v24, %v626_v23 }
 0x50e   :  { %v634_v27 = vpop.permute.xlu0 %633 }
 0x510   :  { %v630_v26 = vpop.permute.xlu1 %629 }
 0x511   :  { %v637_v28 = vsel %vm145_vm0, %v636_v25, %v630_v26 }
 0x512   :  { %v638_v29 = vsel %vm427_vm2, %v637_v28, %v634_v27 }
 0x513   :  { %714 = vmatmul.msk.f32.vlgmr.msrb.gmra.mxu3 %vm249_vm3, %v638_v29 }
 0x596   :  { %v664_v40 = vpop.f32.mrf.mxu3 }
 0x597   :  { %v665_v41 = vadd.f32 %v664_v40, %v643_v39 }
 0x599   :  { %668 = vst.msk [vmem:[#allocation13 + $0x8] sm:$0xff] %vm249_vm3, %v665_v41 }
 0x59a   :  { %681 = dma.vmem_to_hbm [thread:$0]  %s674_s16, 256, %s676_s18, [#allocation4], %s943_s25, %s943_s25, %s944_s26  }
 0x59b   :  { %940 = dma.done.wait [#allocation4], 256  }
 0x59c   :  { %941 = vsyncadd [#allocation4], 4294967040 }
 0x59d   :  { %686 = vsyncpa [#allocation3], 1 }
 0x59e   :  { %687 = vsyncpa [#allocation6], 1 }
 0x59f   :  { %688 = vsyncpa [#allocation9], 1 }
 0x5a0   :  { %689 = vsyncpa [#allocation12], 1 }
 0x5a1   :  { %690 = vsyncpa [#allocation4], 1 }

</bundles_post_ra>
